<compile_context>
chip_gen: v7x
topology: tpu7x:2x2x1
jax: 0.10.0
libtpu: 0.0.40
codegen_flags: <defaults>
</compile_context>

<pallas_src>
import jax
import jax.numpy as jnp
from jax import lax
from jax.experimental import pallas as pl
from jax.experimental.pallas import tpu as pltpu

HIDDEN = 100        # matches self.hidden_size = 100 in the PyTorch module
HIDDEN_PAD = 128    # lane-aligned padded hidden size
LANE = 128
SUBLANE = 8


def _round_up(x, m):
    return (x + m - 1) // m * m


def _lstm_kernel(tmax_ref, len_ref, xg_ref, w_hh_ref, w_out_ref, b_out_ref, out_ref):
    """Single invocation: serial LSTM recurrence + final projection.

    tmax_ref  : SMEM (1,) int32        loop bound = max valid length
    len_ref   : VMEM (Bp, 1) int32     per-row valid length
    xg_ref    : VMEM (T, Bp, 4*Hp) f32 precomputed x_t @ W_ih^T + bias (time-major)
    w_hh_ref  : VMEM (Hp, 4*Hp) f32    recurrent weights (transposed, gate-padded)
    w_out_ref : VMEM (Hp, Op) f32      output projection (transposed, padded)
    b_out_ref : VMEM (1, Op) f32
    out_ref   : VMEM (Bp, Op) f32
    """
    Hp = w_hh_ref.shape[0]
    Bp = out_ref.shape[0]

    t_max = tmax_ref[0]
    w_hh = w_hh_ref[...]                 # hoisted out of the time loop
    last_t = len_ref[...] - 1            # (Bp, 1) int32, hoisted

    h0 = jnp.zeros((Bp, Hp), jnp.float32)
    c0 = jnp.zeros((Bp, Hp), jnp.float32)
    rep0 = jnp.zeros((Bp, Hp), jnp.float32)

    def step(t, carry):
        h, c, rep = carry
        # Only the recurrent matmul remains on the serial critical path.
        gates = xg_ref[t] + jnp.dot(h, w_hh, preferred_element_type=jnp.float32)
        i_g = jax.nn.sigmoid(gates[:, 0 * Hp:1 * Hp])   # lane-aligned slices
        f_g = jax.nn.sigmoid(gates[:, 1 * Hp:2 * Hp])
        g_g = jnp.tanh(gates[:, 2 * Hp:3 * Hp])
        o_g = jax.nn.sigmoid(gates[:, 3 * Hp:4 * Hp])
        c_new = f_g * c + i_g * g_g
        h_new = o_g * jnp.tanh(c_new)
        # capture h at each row's last valid timestep
        rep = jnp.where(t == last_t, h_new, rep)
        return (h_new, c_new, rep)

    _, _, rep = lax.fori_loop(0, t_max, step, (h0, c0, rep0))

    out_ref[...] = (jnp.dot(rep, w_out_ref[...], preferred_element_type=jnp.float32)
                    + b_out_ref[...])


def _pad_gate_blocks(w, h, hp):
    """Zero-pad a packed-gate array (4h, ...) -> (4hp, ...) per gate block [i,f,g,o]."""
    pads = ((0, hp - h),) + ((0, 0),) * (w.ndim - 1)
    return jnp.concatenate(
        [jnp.pad(w[k * h:(k + 1) * h], pads) for k in range(4)], axis=0)


def lstm_forward(x, lengths, params):
    """x: (B, T) int32 token ids; lengths: (B,) valid lengths.  Returns (B, O) logits."""
    emb_table, w_ih, w_hh, b_ih, b_hh, w_out, b_out = params
    B, T = x.shape
    H = HIDDEN
    Hp = HIDDEN_PAD
    O = w_out.shape[0]
    Op = _round_up(O, LANE)
    Bp = _round_up(B, SUBLANE)

    lengths = jnp.clip(lengths.astype(jnp.int32), 1, T)

    # ---- per-gate zero-padding H -> Hp so gate slices are lane-aligned ----
    w_ih_p = _pad_gate_blocks(w_ih, H, Hp)                                   # (4Hp, D)
    w_hh_p = jnp.pad(_pad_gate_blocks(w_hh, H, Hp), ((0, 0), (0, Hp - H)))   # (4Hp, Hp)
    b_p = _pad_gate_blocks(b_ih + b_hh, H, Hp)                               # (4Hp,)
    w_out_p = jnp.pad(w_out, ((0, Op - O), (0, Hp - H)))                     # (Op, Hp)
    b_out_p = jnp.pad(b_out, (0, Op - O)).reshape(1, Op)                     # (1, Op)

    # ---- embedding lookup + hoisted input->hidden GEMM (off the serial path) ----
    emb = emb_table[x].astype(jnp.float32)                                   # (B, T, D)
    emb = jnp.pad(emb, ((0, Bp - B), (0, 0), (0, 0)))                        # (Bp, T, D)
    x_gates = (jnp.einsum('btd,gd->tbg', emb, w_ih_p,
                          preferred_element_type=jnp.float32)
               + b_p)                                                        # (T, Bp, 4Hp)

    len_p = jnp.pad(lengths, (0, Bp - B), constant_values=1).reshape(Bp, 1)
    t_max = jnp.max(lengths).reshape(1).astype(jnp.int32)

    out = pl.pallas_call(
        _lstm_kernel,
        out_shape=jax.ShapeDtypeStruct((Bp, Op), jnp.float32),
        in_specs=[
            pl.BlockSpec(memory_space=pltpu.MemorySpace.SMEM),   # t_max (1,)
            pl.BlockSpec(memory_space=pltpu.MemorySpace.VMEM),   # lengths (Bp,1)
            pl.BlockSpec(memory_space=pltpu.MemorySpace.VMEM),   # x_gates (T,Bp,4Hp)
            pl.BlockSpec(memory_space=pltpu.MemorySpace.VMEM),   # W_hh^T (Hp,4Hp)
            pl.BlockSpec(memory_space=pltpu.MemorySpace.VMEM),   # W_out^T (Hp,Op)
            pl.BlockSpec(memory_space=pltpu.MemorySpace.VMEM),   # b_out (1,Op)
        ],
        out_specs=pl.BlockSpec(memory_space=pltpu.MemorySpace.VMEM),
    )(t_max, len_p, x_gates, jnp.transpose(w_hh_p), jnp.transpose(w_out_p), b_out_p)

    return out[:B, :O]


def reference_forward(x, lengths, params):
    """Pure-JAX reference mirroring the PyTorch forward (non-bidirectional)."""
    emb_table, w_ih, w_hh, b_ih, b_hh, w_out, b_out = params
    B, T = x.shape
    H = HIDDEN
    lengths = jnp.clip(lengths.astype(jnp.int32), 1, T)
    emb = emb_table[x].astype(jnp.float32)              # (B, T, D)

    def step(carry, x_t):
        h, c = carry
        gates = x_t @ w_ih.T + h @ w_hh.T + b_ih + b_hh
        i_g = jax.nn.sigmoid(gates[:, 0 * H:1 * H])
        f_g = jax.nn.sigmoid(gates[:, 1 * H:2 * H])
        g_g = jnp.tanh(gates[:, 2 * H:3 * H])
        o_g = jax.nn.sigmoid(gates[:, 3 * H:4 * H])
        c = f_g * c + i_g * g_g
        h = o_g * jnp.tanh(c)
        return (h, c), h

    h0 = jnp.zeros((B, H), jnp.float32)
    (_, _), hs = lax.scan(step, (h0, h0), jnp.transpose(emb, (1, 0, 2)))
    hs = jnp.transpose(hs, (1, 0, 2))                   # (B, T, H)
    rep = hs[jnp.arange(B), lengths - 1, :]             # ht[i, lengths[i]-1, :]
    return rep @ w_out.T + b_out


def make_params(key, num_embeddings, dim, output_size):
    H = HIDDEN
    ks = jax.random.split(key, 7)
    scale = 1.0 / jnp.sqrt(H)
    emb_table = jax.random.normal(ks[0], (num_embeddings, dim), jnp.float32)
    # PyTorch LSTM weights: weight_ih (4H, D), weight_hh (4H, H), b_ih (4H,), b_hh (4H,)
    w_ih = jax.random.uniform(ks[1], (4 * H, dim), jnp.float32, -scale, scale)
    w_hh = jax.random.uniform(ks[2], (4 * H, H), jnp.float32, -scale, scale)
    b_ih = jax.random.uniform(ks[3], (4 * H,), jnp.float32, -scale, scale)
    b_hh = jax.random.uniform(ks[4], (4 * H,), jnp.float32, -scale, scale)
    # Linear: weight (O, H), bias (O,)
    w_out = jax.random.uniform(ks[5], (output_size, H), jnp.float32, -scale, scale)
    b_out = jax.random.uniform(ks[6], (output_size,), jnp.float32, -scale, scale)
    return (emb_table, w_ih, w_hh, b_ih, b_hh, w_out, b_out)


if __name__ == "__main__":
    key = jax.random.PRNGKey(0)
    k_param, k_x, k_len = jax.random.split(key, 3)

    num_embeddings, dim = 50, 32
    output_size = 5
    batch, max_len = 4, 8

    params = make_params(k_param, num_embeddings, dim, output_size)
    x = jax.random.randint(k_x, (batch, max_len), 0, num_embeddings, jnp.int32)
    lengths = jnp.array([8, 5, 3, 1], dtype=jnp.int32)

    logits = lstm_forward(x, lengths, params)
    logits = jax.block_until_ready(logits)

    ref = reference_forward(x, lengths, params)
    assert logits.shape == (batch, output_size)
    assert jnp.allclose(logits, ref, atol=1e-3, rtol=1e-3), (logits, ref)

    # TODO(synk): bidirectional=True branch of the module is not implemented
    # (the default constructor arg is unidirectional, which is what this covers).
    print("KERNEL_OK")
</pallas_src>

<mosaic_0001>
module attributes {stable_mosaic.version = 11 : i64} {
  func.func @_lstm_kernel(%arg0: memref<1xi32, #tpu.memory_space<smem>>, %arg1: memref<8x1xi32, #tpu.memory_space<vmem>>, %arg2: memref<8x8x512xf32, #tpu.memory_space<vmem>>, %arg3: memref<128x512xf32, #tpu.memory_space<vmem>>, %arg4: memref<128x128xf32, #tpu.memory_space<vmem>>, %arg5: memref<1x128xf32, #tpu.memory_space<vmem>>, %arg6: memref<8x128xf32, #tpu.memory_space<vmem>>) attributes {dimension_semantics = [], scalar_prefetch = 0 : i64, scratch_operands = 0 : i64, tpu.core_type = #tpu.core_type<tc>} {
    %c0 = arith.constant 0 : index
    %0 = memref.load %arg0[%c0] : memref<1xi32, #tpu.memory_space<smem>>
    %c0_0 = arith.constant 0 : index
    %c0_1 = arith.constant 0 : index
    %1 = vector.load %arg3[%c0_0, %c0_1] : memref<128x512xf32, #tpu.memory_space<vmem>>, vector<128x512xf32>
    %c0_2 = arith.constant 0 : index
    %c0_3 = arith.constant 0 : index
    %2 = vector.load %arg1[%c0_2, %c0_3] : memref<8x1xi32, #tpu.memory_space<vmem>>, vector<8x1xi32>
    %c1_i32 = arith.constant 1 : i32
    %3 = vector.broadcast %c1_i32 : i32 to vector<8x1xi32>
    %4 = arith.subi %2, %3 : vector<8x1xi32>
    %cst = arith.constant 0.000000e+00 : f32
    %5 = vector.broadcast %cst : f32 to vector<8x128xf32>
    %cst_4 = arith.constant 0.000000e+00 : f32
    %6 = vector.broadcast %cst_4 : f32 to vector<8x128xf32>
    %cst_5 = arith.constant 0.000000e+00 : f32
    %7 = vector.broadcast %cst_5 : f32 to vector<8x128xf32>
    %c0_i32 = arith.constant 0 : i32
    %8 = arith.subi %0, %c0_i32 : i32
    %9 = arith.addi %c0_i32, %8 : i32
    %c1_i32_6 = arith.constant 1 : i32
    %10:3 = scf.for %arg7 = %c0_i32 to %9 step %c1_i32_6 iter_args(%arg8 = %5, %arg9 = %6, %arg10 = %7) -> (vector<8x128xf32>, vector<8x128xf32>, vector<8x128xf32>)  : i32 {
      %17 = arith.index_cast %arg7 : i32 to index
      %c0_14 = arith.constant 0 : index
      %c0_15 = arith.constant 0 : index
      %18 = vector.load %arg2[%17, %c0_14, %c0_15] : memref<8x8x512xf32, #tpu.memory_space<vmem>>, vector<1x8x512xf32>
      %19 = vector.shape_cast %18 : vector<1x8x512xf32> to vector<8x512xf32>
      %cst_16 = arith.constant dense<0.000000e+00> : vector<8x512xf32>
      %20 = tpu.matmul %arg8, %1, %cst_16 {dimension_numbers = #tpu.dot_dimension_numbers<[1], [0], [0], [1], [0, 0, 1, 1], [], []>} : vector<8x128xf32>, vector<128x512xf32>, vector<8x512xf32> -> vector<8x512xf32>
      %21 = arith.addf %19, %20 : vector<8x512xf32>
      %22 = vector.extract_strided_slice %21 {offsets = [0, 0], sizes = [8, 128], strides = [1, 1]} : vector<8x512xf32> to vector<8x128xf32>
      %23 = arith.negf %22 : vector<8x128xf32>
      %24 = math.exp %23 : vector<8x128xf32>
      %cst_17 = arith.constant 1.000000e+00 : f32
      %25 = vector.broadcast %cst_17 : f32 to vector<8x128xf32>
      %26 = arith.addf %25, %24 : vector<8x128xf32>
      %27 = arith.divf %25, %26 : vector<8x128xf32>
      %28 = vector.extract_strided_slice %21 {offsets = [0, 128], sizes = [8, 128], strides = [1, 1]} : vector<8x512xf32> to vector<8x128xf32>
      %29 = arith.negf %28 : vector<8x128xf32>
      %30 = math.exp %29 : vector<8x128xf32>
      %cst_18 = arith.constant 1.000000e+00 : f32
      %31 = vector.broadcast %cst_18 : f32 to vector<8x128xf32>
      %32 = arith.addf %31, %30 : vector<8x128xf32>
      %33 = arith.divf %31, %32 : vector<8x128xf32>
      %34 = vector.extract_strided_slice %21 {offsets = [0, 256], sizes = [8, 128], strides = [1, 1]} : vector<8x512xf32> to vector<8x128xf32>
      %35 = math.tanh %34 : vector<8x128xf32>
      %36 = vector.extract_strided_slice %21 {offsets = [0, 384], sizes = [8, 128], strides = [1, 1]} : vector<8x512xf32> to vector<8x128xf32>
      %37 = arith.negf %36 : vector<8x128xf32>
      %38 = math.exp %37 : vector<8x128xf32>
      %cst_19 = arith.constant 1.000000e+00 : f32
      %39 = vector.broadcast %cst_19 : f32 to vector<8x128xf32>
      %40 = arith.addf %39, %38 : vector<8x128xf32>
      %41 = arith.divf %39, %40 : vector<8x128xf32>
      %42 = arith.mulf %33, %arg9 : vector<8x128xf32>
      %43 = arith.mulf %27, %35 : vector<8x128xf32>
      %44 = arith.addf %42, %43 : vector<8x128xf32>
      %45 = math.tanh %44 : vector<8x128xf32>
      %46 = arith.mulf %41, %45 : vector<8x128xf32>
      %47 = vector.broadcast %arg7 : i32 to vector<8x1xi32>
      %48 = arith.cmpi eq, %47, %4 : vector<8x1xi32>
      %49 = vector.shape_cast %48 : vector<8x1xi1> to vector<8x1xi1>
      %50 = vector.broadcast %49 : vector<8x1xi1> to vector<8x128xi1>
      %51 = arith.select %50, %46, %arg10 : vector<8x128xi1>, vector<8x128xf32>
      scf.yield %46, %44, %51 : vector<8x128xf32>, vector<8x128xf32>, vector<8x128xf32>
    }
    %c0_7 = arith.constant 0 : index
    %c0_8 = arith.constant 0 : index
    %11 = vector.load %arg4[%c0_7, %c0_8] : memref<128x128xf32, #tpu.memory_space<vmem>>, vector<128x128xf32>
    %cst_9 = arith.constant dense<0.000000e+00> : vector<8x128xf32>
    %12 = tpu.matmul %10#2, %11, %cst_9 {dimension_numbers = #tpu.dot_dimension_numbers<[1], [0], [0], [1], [0, 0, 1, 1], [], []>} : vector<8x128xf32>, vector<128x128xf32>, vector<8x128xf32> -> vector<8x128xf32>
    %c0_10 = arith.constant 0 : index
    %c0_11 = arith.constant 0 : index
    %13 = vector.load %arg5[%c0_10, %c0_11] : memref<1x128xf32, #tpu.memory_space<vmem>>, vector<1x128xf32>
    %14 = vector.broadcast %13 : vector<1x128xf32> to vector<8x128xf32>
    %15 = arith.addf %12, %14 : vector<8x128xf32>
    %c0_12 = arith.constant 0 : index
    %c0_13 = arith.constant 0 : index
    %16 = vector.load %arg6[%c0_12, %c0_13] : memref<8x128xf32, #tpu.memory_space<vmem>>, vector<8x128xf32>
    tpu.vector_store %arg6[%c0_12, %c0_13], %15 {strides = array<i32>} : memref<8x128xf32, #tpu.memory_space<vmem>>, vector<8x128xf32>,
    return
  }
}

</mosaic_0001>

<bundles_post_ra>
// kernel: tpu_custom_call.1
= control target key start
LH: loop header
LB: loop body
LE: loop exit
PB: predicated region body
PF: predicated region fallthrough
CT: control target
= control target key end

     0   :  { %12 = vsyncpa [#allocation4], 0  ;;  %s1156_s0 = inlined_call_operand.<no memory space> [shape: s32[1], index: 0, kind: input, shape index: {}]   ;;  %s1157_s1 = inlined_call_operand.vmem [shape: s32[8,1], index: 1, kind: input, shape index: {}]   ;;  %s1158_s2 = inlined_call_operand.hbm [shape: f32[8,8,512], index: 2, kind: input, shape index: {}]   ;;  %s1159_s3 = inlined_call_operand.hbm [shape: f32[128,512], index: 3, kind: input, shape index: {}]   ;;  %s1160_s4 = inlined_call_operand.hbm [shape: f32[128,128], index: 4, kind: input, shape index: {}]   ;;  %s1161_s5 = inlined_call_operand.vmem [shape: f32[1,128], index: 5, kind: input, shape index: {}]   ;;  %s1162_s6 = inlined_call_operand.hbm [shape: f32[8,128], index: 6, kind: output, shape index: {}]  }
   0x1   :  { %13 = vsyncpa [#allocation7], 0 }
   0x2   :  { %14 = vsyncpa [#allocation5], 0  ;;  %s806_s21 = smov [#allocation6]   ;;  %s807_s23 = smov [#allocation3]  }
   0x3   :  { %s36_s22 = sshll.u32 %s806_s21, 4  ;;  %s24_s24 = sshll.u32 %s807_s23, 4  ;;  %s37_s22 = int_to_ptr.vmem [resolvable:$true] %s36_s22  ;;  %s854_s24 = int_to_ptr.vmem [resolvable:$true] %s24_s24 }
   0x4   :  { %s672_s27 = scalar_lea.hbm %s1159_s3, 8192 }
   0x5   :  { %p673_p0 = scmp.ne.s32.totalorder %s1159_s3, %s672_s27  ;;  %p676_p1 = scmp.lt.u32.totalorder %s672_s27, %s1159_s3 }
   0x7   :  { %p678_p2 = pnand %p676_p1, %p673_p0 }
   0x9   :  { %681 = shalt.err (!%p678_p2)
}
   0xa   :  { %s682_s8 = scalar_lea.vmem %s37_s22, 8192  ;;  %p687_p4 = scmp.lt.s32.totalorder %s37_s22, %s37_s22 }
   0xb   :  { %p683_p3 = scmp.ne.s32.totalorder %s37_s22, %s682_s8  ;;  %p688_p5 = scmp.lt.s32.totalorder %s682_s8, %s682_s8 }
   0xd   :  { %p689_p6 = por %p688_p5, %p687_p4 }
   0xf   :  { %p690_p7 = pnand %p689_p6, %p683_p3 }
  0x11   :  { %693 = shalt.err (!%p690_p7)
}
  0x12   :  { %s808_s9 = smov 512   ;;  %s809_s10 = smov 32  }
  0x13   :  { %42 = dma.hbm_to_vmem [thread:$0]  %s1159_s3, 8192, %s37_s22, [#allocation7], %s808_s9, %s808_s9, %s809_s10  }
  0x14   :  { %s694_s15 = scalar_lea.hbm %s1158_s2, 4096 }
  0x15   :  { %p695_p8 = scmp.ne.s32.totalorder %s1158_s2, %s694_s15  ;;  %p698_p9 = scmp.lt.u32.totalorder %s694_s15, %s1158_s2 }
  0x17   :  { %p700_p10 = pnand %p698_p9, %p695_p8 }
  0x19   :  { %703 = shalt.err (!%p700_p10)
}
  0x1a   :  { %s704_s20 = scalar_lea.vmem %s854_s24, 4096  ;;  %p709_p12 = scmp.lt.s32.totalorder %s854_s24, %s854_s24 }
  0x1b   :  { %p705_p11 = scmp.ne.s32.totalorder %s854_s24, %s704_s20  ;;  %p710_p13 = scmp.lt.s32.totalorder %s704_s20, %s704_s20 }
  0x1d   :  { %p711_p0 = por %p710_p13, %p709_p12 }
  0x1f   :  { %p712_p1 = pnand %p711_p0, %p705_p11 }
  0x21   :  { %715 = shalt.err (!%p712_p1)
}
  0x22   :  { %30 = dma.hbm_to_vmem [thread:$0]  %s1158_s2, 4096, %s854_s24, [#allocation4], %s808_s9, %s808_s9, %s809_s10  }
  0x23   :  { %s810_s22 = smov [#allocation8]   ;;  %s716_s27 = scalar_lea.hbm %s1160_s4, 2048 }
  0x24   :  { %s48_s23 = sshll.u32 %s810_s22, 4  ;;  %p717_p2 = scmp.ne.s32.totalorder %s1160_s4, %s716_s27  ;;  %s49_s23 = int_to_ptr.vmem [resolvable:$true] %s48_s23 }
  0x25   :  { %p720_p3 = scmp.lt.u32.totalorder %s716_s27, %s1160_s4 }
  0x27   :  { %p722_p4 = pnand %p720_p3, %p717_p2 }
  0x29   :  { %725 = shalt.err (!%p722_p4)
}
  0x2a   :  { %s726_s8 = scalar_lea.vmem %s49_s23, 2048  ;;  %p731_p6 = scmp.lt.s32.totalorder %s49_s23, %s49_s23 }
  0x2b   :  { %p727_p5 = scmp.ne.s32.totalorder %s49_s23, %s726_s8  ;;  %p732_p7 = scmp.lt.s32.totalorder %s726_s8, %s726_s8 }
  0x2d   :  { %p733_p8 = por %p732_p7, %p731_p6 }
  0x2f   :  { %p734_p9 = pnand %p733_p8, %p727_p5 }
  0x31   :  { %737 = shalt.err (!%p734_p9)
}
  0x32   :  { %s811_s2 = smov 128   ;;  %s812_s24 = smov 8  }
  0x33   :  { %54 = dma.hbm_to_vmem [thread:$0]  %s1160_s4, 2048, %s49_s23, [#allocation7], %s811_s2, %s811_s2, %s812_s24  }
  0x34   :  { %780 = dma.done.wait [#allocation4], 4096  }
  0x35   :  { %781 = vsyncadd [#allocation4], 4294963200 }
  0x36   :  { %782 = dma.done.wait [#allocation7], 10240  }
  0x37   :  { %783 = vsyncadd [#allocation7], 4294957056  ;;  %v897_v0 = vld [vmem:[#allocation6] sm:$0xff]  ;;  %v899_v1 = vld [vmem:[#allocation6 + $0x8] sm:$0xff]  ;;  %p454_p10 = scmp.le.s32.totalorder %s1156_s0, 0 }
  0x38   :  { %1164 = vst [vmem:[#allocation13_spill] sm:$0xff] %v897_v0  ;;  %1165 = vst [vmem:[#allocation14_spill] sm:$0xff] %v899_v1  ;;  %v901_v2 = vld [vmem:[#allocation6 + $0x10] sm:$0xff]  ;;  %v903_v3 = vld [vmem:[#allocation6 + $0x18] sm:$0xff]  ;;  %s1041_s14 = smov (!%p454_p10), 0  }
  0x39   :  { %1166 = vst [vmem:[#allocation15_spill] sm:$0xff] %v901_v2  ;;  %1167 = vst [vmem:[#allocation16_spill] sm:$0xff] %v903_v3  ;;  %v905_v4 = vld [vmem:[#allocation6 + $0x20] sm:$0xff]  ;;  %v907_v5 = vld [vmem:[#allocation6 + $0x28] sm:$0xff] }
  0x3a   :  { %1168 = vst [vmem:[#allocation17_spill] sm:$0xff] %v905_v4  ;;  %1169 = vst [vmem:[#allocation18_spill] sm:$0xff] %v907_v5  ;;  %v909_v6 = vld [vmem:[#allocation6 + $0x30] sm:$0xff]  ;;  %v911_v7 = vld [vmem:[#allocation6 + $0x38] sm:$0xff] }
  0x3b   :  { %1170 = vst [vmem:[#allocation19_spill] sm:$0xff] %v909_v6  ;;  %1171 = vst [vmem:[#allocation20_spill] sm:$0xff] %v911_v7  ;;  %v913_v8 = vld [vmem:[#allocation6 + $0x40] sm:$0xff]  ;;  %v915_v9 = vld [vmem:[#allocation6 + $0x48] sm:$0xff] }
  0x3c   :  { %1172 = vst [vmem:[#allocation21_spill] sm:$0xff] %v913_v8  ;;  %1173 = vst [vmem:[#allocation22_spill] sm:$0xff] %v915_v9  ;;  %v917_v10 = vld [vmem:[#allocation6 + $0x50] sm:$0xff]  ;;  %v919_v11 = vld [vmem:[#allocation6 + $0x58] sm:$0xff] }
  0x3d   :  { %1174 = vst [vmem:[#allocation23_spill] sm:$0xff] %v917_v10  ;;  %1175 = vst [vmem:[#allocation24_spill] sm:$0xff] %v919_v11  ;;  %v921_v12 = vld [vmem:[#allocation6 + $0x60] sm:$0xff]  ;;  %v923_v13 = vld [vmem:[#allocation6 + $0x68] sm:$0xff] }
  0x3e   :  { %1176 = vst [vmem:[#allocation25_spill] sm:$0xff] %v921_v12  ;;  %v925_v14 = vld [vmem:[#allocation6 + $0x70] sm:$0xff]  ;;  %v927_v15 = vld [vmem:[#allocation6 + $0x78] sm:$0xff]  ;;  %v929_v16 = vld [vmem:[#allocation6 + $0x80] sm:$0xff] }
  0x3f   :  { %v931_v17 = vld [vmem:[#allocation6 + $0x88] sm:$0xff]  ;;  %v933_v18 = vld [vmem:[#allocation6 + $0x90] sm:$0xff]  ;;  %v935_v19 = vld [vmem:[#allocation6 + $0x98] sm:$0xff] }
  0x40   :  { %v937_v20 = vld [vmem:[#allocation6 + $0xa0] sm:$0xff]  ;;  %v939_v21 = vld [vmem:[#allocation6 + $0xa8] sm:$0xff]  ;;  %v941_v22 = vld [vmem:[#allocation6 + $0xb0] sm:$0xff] }
  0x41   :  { %v943_v23 = vld [vmem:[#allocation6 + $0xb8] sm:$0xff]  ;;  %v945_v24 = vld [vmem:[#allocation6 + $0xc0] sm:$0xff]  ;;  %v947_v25 = vld [vmem:[#allocation6 + $0xc8] sm:$0xff] }
  0x42   :  { %v949_v26 = vld [vmem:[#allocation6 + $0xd0] sm:$0xff]  ;;  %v951_v27 = vld [vmem:[#allocation6 + $0xd8] sm:$0xff]  ;;  %v953_v28 = vld [vmem:[#allocation6 + $0xe0] sm:$0xff] }
  0x43   :  { %v955_v29 = vld [vmem:[#allocation6 + $0xe8] sm:$0xff]  ;;  %v957_v30 = vld [vmem:[#allocation6 + $0xf0] sm:$0xff]  ;;  %v959_v31 = vld [vmem:[#allocation6 + $0xf8] sm:$0xff] }
  0x44   :  { %v961_v32 = vld [vmem:[#allocation6 + $0x100] sm:$0xff]  ;;  %v963_v33 = vld [vmem:[#allocation6 + $0x108] sm:$0xff]  ;;  %v965_v34 = vld [vmem:[#allocation6 + $0x110] sm:$0xff] }
  0x45   :  { %v967_v35 = vld [vmem:[#allocation6 + $0x118] sm:$0xff]  ;;  %v969_v36 = vld [vmem:[#allocation6 + $0x120] sm:$0xff]  ;;  %v971_v37 = vld [vmem:[#allocation6 + $0x128] sm:$0xff] }
  0x46   :  { %v973_v38 = vld [vmem:[#allocation6 + $0x130] sm:$0xff]  ;;  %v975_v39 = vld [vmem:[#allocation6 + $0x138] sm:$0xff]  ;;  %v977_v40 = vld [vmem:[#allocation6 + $0x140] sm:$0xff] }
  0x47   :  { %v979_v41 = vld [vmem:[#allocation6 + $0x148] sm:$0xff]  ;;  %v981_v42 = vld [vmem:[#allocation6 + $0x150] sm:$0xff]  ;;  %v983_v43 = vld [vmem:[#allocation6 + $0x158] sm:$0xff] }
  0x48   :  { %v985_v44 = vld [vmem:[#allocation6 + $0x160] sm:$0xff]  ;;  %v987_v45 = vld [vmem:[#allocation6 + $0x168] sm:$0xff]  ;;  %v989_v46 = vld [vmem:[#allocation6 + $0x170] sm:$0xff] }
  0x49   :  { %v991_v47 = vld [vmem:[#allocation6 + $0x178] sm:$0xff]  ;;  %v993_v48 = vld [vmem:[#allocation6 + $0x180] sm:$0xff]  ;;  %v995_v49 = vld [vmem:[#allocation6 + $0x188] sm:$0xff] }
  0x4a   :  { %v997_v50 = vld [vmem:[#allocation6 + $0x190] sm:$0xff]  ;;  %v999_v51 = vld [vmem:[#allocation6 + $0x198] sm:$0xff]  ;;  %v1001_v52 = vld [vmem:[#allocation6 + $0x1a0] sm:$0xff]  ;;  %444 = sbr.rel (%p454_p10) target bundleno = 377 (0x179), region = 58 }
  0x4b   :  { %1177 = vst [vmem:[#allocation26_spill] sm:$0xff] %v997_v50  ;;  %v1003_v53 = vld [vmem:[#allocation6 + $0x1a8] sm:$0xff]  ;;  %v1005_v54 = vld [vmem:[#allocation6 + $0x1b0] sm:$0xff]  ;;  %v1007_v55 = vld [vmem:[#allocation6 + $0x1b8] sm:$0xff] }
  0x4c   :  { %1178 = vst [vmem:[#allocation27_spill] sm:$0xff] %v1005_v54  ;;  %v1009_v56 = vld [vmem:[#allocation6 + $0x1c0] sm:$0xff]  ;;  %v1011_v57 = vld [vmem:[#allocation6 + $0x1c8] sm:$0xff]  ;;  %v1013_v58 = vld [vmem:[#allocation6 + $0x1d0] sm:$0xff] }
  0x4d   :  { %1179 = vst [vmem:[#allocation28_spill] sm:$0xff] %v1009_v56  ;;  %1180 = vst [vmem:[#allocation29_spill] sm:$0xff] %v1013_v58  ;;  %v1015_v59 = vld [vmem:[#allocation6 + $0x1d8] sm:$0xff]  ;;  %v1017_v60 = vld [vmem:[#allocation6 + $0x1e0] sm:$0xff]  ;;  %v1033_v58 = vmov 0.0   ;;  %v1037_v56 = vmov (!%p454_p10), 0.0  }
  0x4e   :  { %1181 = vst [vmem:[#allocation30_spill] sm:$0xff] %v1017_v60  ;;  %v1019_v61 = vld [vmem:[#allocation6 + $0x1e8] sm:$0xff]  ;;  %v1021_v62 = vld [vmem:[#allocation6 + $0x1f0] sm:$0xff]  ;;  %v1023_v63 = vld [vmem:[#allocation6 + $0x1f8] sm:$0xff]  ;;  %v1035_v60 = vmov (!%p454_p10), 0.0  }
  0x4f   :  { %1182 = vst [vmem:[#allocation31_spill] sm:$0xff] %v1021_v62  ;;  %1183 = vst [vmem:[#allocation32_spill] sm:$0xff] %v1023_v63  ;;  %v131_v54 = vld [vmem:[%s1157_s1] sm:$0xff]  ;;  %v1039_v62 = vmov (!%p454_p10), 0.0  }
  0x50   :  { %v1028_v50 = vadd.s32 4294967295, %v131_v54 }
  0x51 LB: > { %1184 = vst [vmem:[#allocation33_spill] sm:$0xff] %v788_v60  ;;  %1185 = vst [vmem:[#allocation34_spill] sm:$0xff] %v792_v56  ;;  %v1187_v1 = vld [vmem:[#allocation14_spill] sm:$0xff]  ;;  %v1189_v0 = vld [vmem:[#allocation13_spill] sm:$0xff]  ;;  %s461_s1 = sshll.u32 %s800_s14, 5  ;;  %s800_s14 = sphi %s1041_s14, %s136_s14   ;;  %v796_v62 = vphi %v1039_v62, %v318_v62   ;;  %v792_v56 = vphi %v1037_v56, %v316_v56   ;;  %v788_v60 = vphi %v1035_v60, %v1210_v60  }
  0x52   : > { %1186 = vst [vmem:[#allocation35_spill] sm:$0xff] %v796_v62  ;;  %v1188_v5 = vld [vmem:[#allocation18_spill] sm:$0xff]  ;;  %v1190_v4 = vld [vmem:[#allocation17_spill] sm:$0xff]  ;;  %v1192_v3 = vld [vmem:[#allocation16_spill] sm:$0xff]  ;;  %s144_s15 = scalar_lea.vmem [#allocation3], %s461_s1 }
  0x53   : > { %v514_v54 = vpack.c.bf16 %v1188_v5, %v1187_v1  ;;  %v516_v58 = vpack.c.bf16 %v1190_v4, %v1189_v0  ;;  %v1191_v9 = vld [vmem:[#allocation22_spill] sm:$0xff]  ;;  %v1193_v7 = vld [vmem:[#allocation20_spill] sm:$0xff]  ;;  %v1194_v2 = vld [vmem:[#allocation15_spill] sm:$0xff]  ;;  %v522_v0 = vpack.c.bf16 %v939_v21, %v931_v17  ;;  %v558_v4 = vpack.c.bf16 %v959_v31, %v951_v27 }
  0x54   : > { %v518_v63 = vpack.c.bf16 %v923_v13, %v1191_v9  ;;  %v546_v60 = vpack.c.bf16 %v1193_v7, %v1192_v3  ;;  %v1195_v6 = vld [vmem:[#allocation19_spill] sm:$0xff]  ;;  %v1196_v8 = vld [vmem:[#allocation21_spill] sm:$0xff]  ;;  %v1198_v11 = vld [vmem:[#allocation24_spill] sm:$0xff]  ;;  %v524_v3 = vpack.c.bf16 %v937_v20, %v929_v16 }
  0x55   : > { %515 = vmatprep.subr.bf16.mxu0 %v514_v54  ;;  %v548_v56 = vpack.c.bf16 %v1195_v6, %v1194_v2  ;;  %v1197_v12 = vld [vmem:[#allocation25_spill] sm:$0xff]  ;;  %v550_v1 = vpack.c.bf16 %v927_v15, %v1198_v11  ;;  %v1199_v10 = vld [vmem:[#allocation23_spill] sm:$0xff]  ;;  %v813_v2 = vmov 0.0   ;;  %v1203_v5 = vld [vmem:[#allocation28_spill] sm:$0xff] }
  0x56   : > { %517 = vmatpush1.bf16.msra.mxu0 %v516_v58  ;;  %v520_v62 = vpack.c.bf16 %v1197_v12, %v1196_v8  ;;  %547 = vmatprep.subr.bf16.mxu1 %v546_v60  ;;  %v552_v54 = vpack.c.bf16 %v925_v14, %v1199_v10  ;;  %v554_v58 = vpack.c.bf16 %v943_v23, %v935_v19  ;;  %v1204_v6 = vld [vmem:[#allocation30_spill] sm:$0xff]  ;;  %v1205_v7 = vld [vmem:[#allocation29_spill] sm:$0xff] }
  0x57   : > { %519 = vmatprep.subr.bf16.mxu0 %v518_v63  ;;  %549 = vmatpush1.bf16.msra.mxu1 %v548_v56  ;;  %v526_v60 = vpack.c.bf16 %v955_v29, %v947_v25  ;;  %v556_v56 = vpack.c.bf16 %v941_v22, %v933_v18  ;;  %v814_v63 = vmov 0  }
  0x58   : > { %551 = vmatprep.subr.bf16.mxu1 %v550_v1  ;;  %213 = vmatprep.mubr.f32.mxu0 %v813_v2  ;;  %v319_v1 = vstv %s800_s14  ;;  %s136_s14 = sadd.s32 1, %s800_s14  }
  0x59   : > { %284 = vmatprep.mubr.f32.mxu1 %v813_v2  ;;  %655 = vset.pattern.permute.xlu0 %v814_v63  ;;  %vm320_vm0 = vcmp.eq.s32.totalorder %v319_v1, %v1028_v50  ;;  %v538_v1 = vpack.c.bf16 %v1003_v53, %v995_v49  ;;  %p135_p11 = scmp.ge.s32.totalorder %s136_s14, %s1156_s0 }
  0x5a   : > { %521 = vmatpush1.bf16.msra.mxu0 %v520_v62  ;;  %v321_v2 = vsel %vm320_vm0, 1, %v814_v63  ;;  %v530_v62 = vpack.c.bf16 %v971_v37, %v963_v33  ;;  %v564_v63 = vpack.c.bf16 %v973_v38, %v965_v34 }
  0x5b   : > { %523 = vmatprep.subr.bf16.mxu0 %v522_v0  ;;  %553 = vmatpush1.bf16.msra.mxu1 %v552_v54  ;;  %v528_v0 = vpack.c.bf16 %v953_v28, %v945_v24  ;;  %v560_v54 = vpack.c.bf16 %v957_v30, %v949_v26 }
  0x5c   : > { %555 = vmatprep.subr.bf16.mxu1 %v554_v58  ;;  %323 = vperm.xlu0 %655, %v321_v2   ;;  %v562_v58 = vpack.c.bf16 %v975_v39, %v967_v35  ;;  %v570_v2 = vpack.c.bf16 %v1007_v55, %v999_v51 }
  0x5e   : > { %525 = vmatpush1.bf16.msra.mxu0 %v524_v3  ;;  %v532_v3 = vpack.c.bf16 %v969_v36, %v961_v32 }
  0x5f   : > { %527 = vmatprep.subr.bf16.mxu0 %v526_v60  ;;  %557 = vmatpush1.bf16.msra.mxu1 %v556_v56  ;;  %v534_v60 = vpack.c.bf16 %v987_v45, %v979_v41  ;;  %v566_v56 = vpack.c.bf16 %v991_v47, %v983_v43 }
  0x60   : > { %559 = vmatprep.subr.bf16.mxu1 %v558_v4  ;;  %v536_v4 = vpack.c.bf16 %v985_v44, %v977_v40 }
  0x62   : > { %529 = vmatpush1.bf16.msra.mxu0 %v528_v0  ;;  %v568_v0 = vpack.c.bf16 %v989_v46, %v981_v42 }
  0x63   : > { %531 = vmatprep.subr.bf16.mxu0 %v530_v62  ;;  %561 = vmatpush1.bf16.msra.mxu1 %v560_v54  ;;  %v540_v62 = vpack.c.bf16 %v1001_v52, %v993_v48  ;;  %v542_v54 = vpack.c.bf16 %v1019_v61, %v1011_v57 }
  0x64   : > { %563 = vmatprep.subr.bf16.mxu1 %v562_v58  ;;  %v1200_v58 = vld [vmem:[#allocation26_spill] sm:$0xff] }
  0x66   : > { %533 = vmatpush1.bf16.msra.mxu0 %v532_v3  ;;  %v1201_v3 = vld [vmem:[#allocation27_spill] sm:$0xff] }
  0x67   : > { %535 = vmatprep.subr.bf16.mxu0 %v534_v60  ;;  %565 = vmatpush1.bf16.msra.mxu1 %v564_v63  ;;  %v572_v60 = vpack.c.bf16 %v1201_v3, %v1200_v58  ;;  %v1202_v63 = vld [vmem:[#allocation32_spill] sm:$0xff]  ;;  %v146_v58 = vld [vmem:[%s144_s15 + $0x8] sm:$0xff]  ;;  %v147_v3 = vld [vmem:[%s144_s15 + $0x10] sm:$0xff] }
  0x68   : > { %567 = vmatprep.subr.bf16.mxu1 %v566_v56  ;;  %v574_v56 = vpack.c.bf16 %v1202_v63, %v1015_v59 }
  0x6a   : > { %537 = vmatpush1.bf16.msra.mxu0 %v536_v4  ;;  %v544_v4 = vpack.c.bf16 %v1204_v6, %v1203_v5  ;;  %v148_v6 = vld [vmem:[%s144_s15 + $0x18] sm:$0xff] }
  0x6b   : > { %539 = vmatprep.subr.bf16.mxu0 %v538_v1  ;;  %569 = vmatpush1.bf16.msra.mxu1 %v568_v0  ;;  %v1206_v1 = vld [vmem:[#allocation31_spill] sm:$0xff] }
  0x6c   : > { %571 = vmatprep.subr.bf16.mxu1 %v570_v2  ;;  %v576_v8 = vpack.c.bf16 %v1206_v1, %v1205_v7  ;;  %v1207_v0 = vld [vmem:[#allocation35_spill] sm:$0xff]  ;;  %v145_v2 = vld [vmem:[%s144_s15] sm:$0xff] }
  0x6e   : > { %541 = vmatpush1.bf16.msra.mxu0 %v540_v62 }
  0x6f   : > { %543 = vmatprep.subr.bf16.mxu0 %v542_v54  ;;  %573 = vmatpush1.bf16.msra.mxu1 %v572_v60 }
  0x70   : > { %575 = vmatprep.subr.bf16.mxu1 %v574_v56 }
  0x72   : > { %545 = vmatpush1.bf16.msra.mxu0 %v544_v4 }
  0x73   : > { %577 = vmatpush1.bf16.msra.mxu1 %v576_v8 }
  0x75   : > { %214 = vmatmul.mubr.f32.vlgmr.msra.gmra.mrb[0].mxu0 %v1207_v0 }
  0x76   : > { %285 = vmatmul.mubr.f32.vlgmr.msra.gmra.mrb[0].mxu1 %v1207_v0 }
 0x148   : > { %v215_v62 = vpop.f32.mrb[0].mxu0 }
 0x149   : > { %v291_v63 = vadd.f32 %v215_v62, %v145_v2  ;;  %v217_v5 = vpop.f32.mrb[1].mxu0  ;;  %v286_v60 = vpop.f32.mrb[0].mxu1 }
 0x14a   : > { %v292_v54 = vadd.f32 %v217_v5, %v146_v58  ;;  %v293_v7 = vadd.f32 %v286_v60, %v147_v3  ;;  %v288_v56 = vpop.f32.mrb[1].mxu1  ;;  %v1208_v60 = vld [vmem:[#allocation34_spill] sm:$0xff] }
 0x14b   : > { %v457_v9 = vmul.f32 -1.442695, %v291_v63  ;;  %v294_v8 = vadd.f32 %v288_v56, %v148_v6 }
 0x14c   : > { %v458_v4 = vmul.f32 -1.442695, %v292_v54 }
 0x14d   : > { %656 = vpow2.f32 %v457_v9  ;;  %v459_v1 = vmul.f32 -1.442695, %v294_v8  ;;  %v324_v9 = vpop.permute.xlu0 %323 }
 0x14e   : > { %658 = vpow2.f32 %v458_v4  ;;  %vm325_vm1 = vcmp.eq.s32.totalorder %v324_v9, 1 }
 0x14f   : > { %660 = vpow2.f32 %v459_v1 }
 0x150   : > { %662 = vtanh.f32 %v293_v7  ;;  %v1209_v7 = vld [vmem:[#allocation33_spill] sm:$0xff] }
 0x157   : > { %v657_v0 = vpop.eup %656 }
 0x158   : > { %v659_v10 = vpop.eup %658  ;;  %v298_v11 = vadd.f32 1.0, %v657_v0 }
 0x159   : > { %v304_v12 = vadd.f32 1.0, %v659_v10  ;;  %v661_v2 = vpop.eup %660 }
 0x15a   : > { %664 = vrcp.f32 %v298_v11  ;;  %v663_v62 = vpop.eup %662  ;;  %v311_v5 = vadd.f32 1.0, %v661_v2 }
 0x15b   : > { %666 = vrcp.f32 %v304_v12 }
 0x15c   : > { %668 = vrcp.f32 %v311_v5 }
 0x164   : > { %v665_v58 = vpop.eup %664 }
 0x165   : > { %v667_v63 = vpop.eup %666  ;;  %v315_v3 = vmul.f32 %v665_v58, %v663_v62 }
 0x166   : > { %v314_v54 = vmul.f32 %v1208_v60, %v667_v63  ;;  %v669_v6 = vpop.eup %668 }
 0x168   : > { %v316_v56 = vadd.f32 %v315_v3, %v314_v54  }
 0x16a   : > { %670 = vtanh.f32 %v316_v56 }
 0x172   :  { %138 = sbr.rel (!%p135_p11) target bundleno = 81 (0x51), region = 64 }
 0x174   : > { %v671_v4 = vpop.eup %670 }
 0x175   : > { %v318_v62 = vmul.f32 %v671_v4, %v669_v6  }
 0x177   : > { %v326_v10 = vsel %vm325_vm1, %v318_v62, %v1209_v7  }
 0x178   : > { %v1210_v60 = vmov %v326_v10  ;;  %v1211_v58 = vmov (%p135_p11), %v326_v10 }
 0x179 PF:  { %v327_v11 = vld [vmem:[#allocation8] sm:$0xff]  ;;  %v328_v12 = vld [vmem:[#allocation8 + $0x8] sm:$0xff]  ;;  %v329_v8 = vld [vmem:[#allocation8 + $0x10] sm:$0xff]  ;;  %v815_v1 = vmov 0.0|0.0   ;;  %vm816_vm2 = vmmov 0   ;;  %v817_v5 = vmov 0.0   ;;  %v804_v58 = vphi %v1033_v58, %v1211_v58  }
 0x17a   :  { %578 = vmatprep.subr.bf16.mxu0 %v815_v1  ;;  %v579_v0 = vpack.c.bf16 %v328_v12, %v327_v11  ;;  %v330_v2 = vld [vmem:[#allocation8 + $0x18] sm:$0xff]  ;;  %511 = vmatprep.mubr.msk.f32.mxu0 %vm816_vm2, %v817_v5  ;;  %v331_v63 = vld [vmem:[#allocation8 + $0x20] sm:$0xff]  ;;  %v332_v13 = vld [vmem:[#allocation8 + $0x28] sm:$0xff]  ;;  %s818_s19 = smov [#allocation9]  }
 0x17b   :  { %v582_v62 = vpack.c.bf16 %v330_v2, %v329_v8  ;;  %v585_v14 = vpack.c.bf16 %v332_v13, %v331_v63  ;;  %v333_v15 = vld [vmem:[#allocation8 + $0x30] sm:$0xff]  ;;  %v334_v16 = vld [vmem:[#allocation8 + $0x38] sm:$0xff]  ;;  %v335_v18 = vld [vmem:[#allocation8 + $0x40] sm:$0xff]  ;;  %s427_s20 = sshll.u32 %s818_s19, 4  ;;  %s428_s20 = int_to_ptr.vmem [resolvable:$true] %s427_s20 }
 0x17c   :  { %580 = vmatpush3.bf16.msra.mxu0 %v579_v0  ;;  %v588_v17 = vpack.c.bf16 %v334_v16, %v333_v15  ;;  %v336_v19 = vld [vmem:[#allocation8 + $0x48] sm:$0xff]  ;;  %v337_v21 = vld [vmem:[#allocation8 + $0x50] sm:$0xff]  ;;  %v338_v22 = vld [vmem:[#allocation8 + $0x58] sm:$0xff]  ;;  %s738_s3 = scalar_lea.vmem %s428_s20, 128  ;;  %p743_p13 = scmp.lt.s32.totalorder %s428_s20, %s428_s20 }
 0x17d   :  { %581 = vmatprep.subr.bf16.mxu0 %v815_v1  ;;  %v591_v20 = vpack.c.bf16 %v336_v19, %v335_v18  ;;  %v594_v23 = vpack.c.bf16 %v338_v22, %v337_v21  ;;  %v339_v24 = vld [vmem:[#allocation8 + $0x60] sm:$0xff]  ;;  %v340_v25 = vld [vmem:[#allocation8 + $0x68] sm:$0xff]  ;;  %v341_v27 = vld [vmem:[#allocation8 + $0x70] sm:$0xff]  ;;  %p739_p12 = scmp.ne.s32.totalorder %s428_s20, %s738_s3  ;;  %p744_p0 = scmp.lt.s32.totalorder %s738_s3, %s738_s3 }
 0x17e   :  { %v597_v26 = vpack.c.bf16 %v340_v25, %v339_v24  ;;  %v342_v28 = vld [vmem:[#allocation8 + $0x78] sm:$0xff]  ;;  %v460_v30 = vld [vmem:[%s1161_s5] ss:$0 sm:$0xff] }
 0x17f   :  { %v600_v29 = vpack.c.bf16 %v342_v28, %v341_v27  ;;  %p745_p1 = por %p744_p0, %p743_p13 }
 0x180   :  { %583 = vmatpush3.bf16.msra.mxu0 %v582_v62 }
 0x181   :  { %584 = vmatprep.subr.bf16.mxu0 %v815_v1  ;;  %p746_p2 = pnand %p745_p1, %p739_p12 }
 0x184   :  { %586 = vmatpush3.bf16.msra.mxu0 %v585_v14 }
 0x185   :  { %587 = vmatprep.subr.bf16.mxu0 %v815_v1 }
 0x188   :  { %589 = vmatpush3.bf16.msra.mxu0 %v588_v17 }
 0x189   :  { %590 = vmatprep.subr.bf16.mxu0 %v815_v1 }
 0x18c   :  { %592 = vmatpush3.bf16.msra.mxu0 %v591_v20 }
 0x18d   :  { %593 = vmatprep.subr.bf16.mxu0 %v815_v1 }
 0x190   :  { %595 = vmatpush3.bf16.msra.mxu0 %v594_v23 }
 0x191   :  { %596 = vmatprep.subr.bf16.mxu0 %v815_v1 }
 0x194   :  { %598 = vmatpush3.bf16.msra.mxu0 %v597_v26 }
 0x195   :  { %599 = vmatprep.subr.bf16.mxu0 %v815_v1 }
 0x198   :  { %601 = vmatpush3.bf16.msra.mxu0 %v600_v29 }
 0x19b   :  { %512 = vmatmul.mubr.f32.vlgmr.msra.gmra.mrb[0].mxu0 %v804_v58 }
 0x26e   :  { %v416_v31 = vpop.f32.mrb[0].mxu0 }
 0x26f   :  { %v417_v32 = vadd.f32 %v460_v30, %v416_v31  ;;  %v513_v33 = vpop.f32.mrb[1].mxu0 }
 0x271   :  { %420 = vst [vmem:[#allocation9] sm:$0xff] %v417_v32 }
 0x272   :  { %749 = shalt.err (!%p746_p2)
}
 0x273   :  { %s750_s23 = scalar_lea.hbm %s1162_s6, 128 }
 0x274   :  { %p751_p3 = scmp.ne.s32.totalorder %s1162_s6, %s750_s23  ;;  %p754_p4 = scmp.lt.u32.totalorder %s750_s23, %s1162_s6 }
 0x276   :  { %p756_p5 = pnand %p754_p4, %p751_p3 }
 0x278   :  { %759 = shalt.err (!%p756_p5)
}
 0x279   :  { %430 = dma.vmem_to_hbm [thread:$0]  %s428_s20, 128, %s1162_s6, [#allocation5]  }
 0x27a   :  { %784 = dma.done.wait [#allocation5], 128  }
 0x27b   :  { %785 = vsyncadd [#allocation5], 4294967168 }
 0x27c   :  { %434 = vsyncpa [#allocation4], 1 }
 0x27d   :  { %435 = vsyncpa [#allocation7], 1 }
 0x27e   :  { %436 = vsyncpa [#allocation5], 1 }

</bundles_post_ra>
